<compile_context>
chip_gen: v7x
topology: tpu7x:2x2x1
jax: 0.10.0
libtpu: 0.0.40
codegen_flags: <defaults>
</compile_context>

<pallas_src>
import numpy as np
import jax
import jax.numpy as jnp
from jax.experimental import pallas as pl
from jax.experimental.pallas import tpu as pltpu


def _round_up(x: int, m: int) -> int:
    return (x + m - 1) // m * m


def _cdiv(a: int, b: int) -> int:
    return (a + b - 1) // b


# Layout constants for the fused EMA master buffer (full 8x128 vreg occupancy).
_EMA_LANES = 1024        # last dim, multiple of 128 (lane-dense, unmasked stores)
_EMA_BLOCK_ROWS = 256    # rows per grid step -> 1 MiB f32 block, fits all VMEM budgets


# ---------------------------------------------------------------------------
# Kernel 1: inner-model forward (conv1x1 -> bias -> ReLU -> conv1x1 -> bias)
# Layout: x block is (C_in, T) = channels on sublanes, pixel tile T on lanes.
# Each 1x1 conv is an unrolled chain of broadcasted VPU FMAs (outer-product
# style (C,1)*(1,T)); output (C_out, T) is written as one lane-dense block.
# ---------------------------------------------------------------------------
def _fwd_kernel(x_ref, w1_ref, b1_ref, w2_ref, b2_ref, o_ref):
    c_hid, c_in = w1_ref.shape
    x = x_ref[...].astype(jnp.float32)       # (C_in, T)
    w1 = w1_ref[...].astype(jnp.float32)     # (C_hid, C_in)
    b1 = b1_ref[...].astype(jnp.float32)     # (C_hid, 1)
    w2 = w2_ref[...].astype(jnp.float32)     # (C_out, C_hid)
    b2 = b2_ref[...].astype(jnp.float32)     # (C_out, 1)

    # conv1x1 #1:  h[c, t] = sum_i w1[c, i] * x[i, t] + b1[c]
    h = b1 + w1[:, 0:1] * x[0:1, :]
    for i in range(1, c_in):
        h = h + w1[:, i:i + 1] * x[i:i + 1, :]
    h = jnp.maximum(h, 0.0)                  # ReLU

    # conv1x1 #2:  y[o, t] = sum_c w2[o, c] * h[c, t] + b2[o]
    y = b2 + w2[:, 0:1] * h[0:1, :]
    for j in range(1, c_hid):
        y = y + w2[:, j:j + 1] * h[j:j + 1, :]

    o_ref[...] = y.astype(o_ref.dtype)       # single lane-dense full-block store


@jax.jit
def forward_inner(params, x_nchw):
    """Forward of the averaged inner model (NCHW in, NCHW out)."""
    n, c_in, hgt, wid = x_nchw.shape
    hw = hgt * wid

    w1 = jnp.asarray(params["w1"], jnp.float32)                 # (C_hid, C_in)
    b1 = jnp.asarray(params["b1"], jnp.float32).reshape(-1, 1)  # (C_hid, 1)
    w2 = jnp.asarray(params["w2"], jnp.float32)                 # (C_out, C_hid)
    b2 = jnp.asarray(params["b2"], jnp.float32).reshape(-1, 1)  # (C_out, 1)
    c_hid = w1.shape[0]
    c_out = w2.shape[0]

    # NCHW -> (N, C, H*W): contiguous reshape, no transpose / extra HBM pass.
    x3d = x_nchw.reshape(n, c_in, hw)

    # Pixel tile on the lane axis: as large as 2048, always a multiple of 128.
    tile = min(2048, _round_up(hw, 128))
    hw_pad = _round_up(hw, tile)
    if hw_pad != hw:
        x3d = jnp.pad(x3d, ((0, 0), (0, 0), (0, hw_pad - hw)))

    grid = (n, hw_pad // tile)

    out3d = pl.pallas_call(
        _fwd_kernel,
        out_shape=jax.ShapeDtypeStruct((n, c_out, hw_pad), x_nchw.dtype),
        grid_spec=pltpu.PrefetchScalarGridSpec(
            num_scalar_prefetch=0,
            grid=grid,
            in_specs=[
                pl.BlockSpec((None, c_in, tile), lambda b, p: (b, 0, p)),
                pl.BlockSpec((c_hid, c_in), lambda b, p: (0, 0)),
                pl.BlockSpec((c_hid, 1), lambda b, p: (0, 0)),
                pl.BlockSpec((c_out, c_hid), lambda b, p: (0, 0)),
                pl.BlockSpec((c_out, 1), lambda b, p: (0, 0)),
            ],
            out_specs=pl.BlockSpec((None, c_out, tile), lambda b, p: (b, 0, p)),
        ),
        compiler_params=pltpu.CompilerParams(
            dimension_semantics=("parallel", "parallel"),
            vmem_limit_bytes=32 * 1024 * 1024),
    )(x3d, w1, b1, w2, b2)

    if hw_pad != hw:
        out3d = out3d[:, :, :hw]
    return out3d.reshape(n, c_out, hgt, wid)


# ---------------------------------------------------------------------------
# Kernel 2: fused EMA parameter update over the flat master buffer.
#   out = avg + momentum * (src - avg), computed in f32, stored in native dtype,
#   avg updated in place via input_output_aliases.
# ---------------------------------------------------------------------------
def _ema_lerp_kernel(mom_ref, avg_ref, src_ref, out_ref):
    m = mom_ref[0, 0]                                   # scalar momentum from SMEM
    a = avg_ref[...].astype(jnp.float32)
    s = src_ref[...].astype(jnp.float32)
    out_ref[...] = (a + (s - a) * m).astype(out_ref.dtype)


@jax.jit
def _ema_update_flat(mom, avg2d, src2d):
    rows, lanes = avg2d.shape
    block_rows = min(_EMA_BLOCK_ROWS, rows)             # rows is padded to a multiple
    grid = (rows // block_rows,)
    return pl.pallas_call(
        _ema_lerp_kernel,
        out_shape=jax.ShapeDtypeStruct(avg2d.shape, avg2d.dtype),
        grid_spec=pltpu.PrefetchScalarGridSpec(
            num_scalar_prefetch=0,
            grid=grid,
            in_specs=[
                pl.BlockSpec(memory_space=pltpu.MemorySpace.SMEM),
                pl.BlockSpec((block_rows, lanes), lambda i: (i, 0)),
                pl.BlockSpec((block_rows, lanes), lambda i: (i, 0)),
            ],
            out_specs=pl.BlockSpec((block_rows, lanes), lambda i: (i, 0)),
        ),
        input_output_aliases={1: 0},                    # avg buffer reused as output
        compiler_params=pltpu.CompilerParams(
            dimension_semantics=("parallel",),
            vmem_limit_bytes=32 * 1024 * 1024),
    )(mom, avg2d, src2d)


# ---------------------------------------------------------------------------
# MomentumAvgModel logic (host-side glue mirroring the PyTorch module)
# ---------------------------------------------------------------------------
class MomentumAvgModelPallas:
    """EMA wrapper mirroring MomentumAvgModel.

    Averaged parameters are stored in ONE flat, lane-dense (rows, 1024) f32
    buffer so update_parameters is a single tiled, aliased pallas_call instead
    of one launch per parameter.
    """

    def __init__(self, params, momentum=0.0002, gamma=100, interval=1):
        assert 0.0 < momentum < 1.0, momentum
        assert gamma > 0, gamma
        self.momentum = momentum
        self.gamma = gamma
        self.interval = interval
        self.steps = 0                      # registered buffer `steps`

        self._names = list(params.keys())
        self._shapes = {k: tuple(np.shape(params[k])) for k in self._names}
        self._sizes = {k: int(np.prod(self._shapes[k])) for k in self._names}
        self._offsets = {}
        off = 0
        for k in self._names:
            self._offsets[k] = off
            off += self._sizes[k]
        self._total = off
        # TODO(synk): mixed-dtype parameter trees would need per-dtype grouping.
        self._dtype = jnp.result_type(*[jnp.asarray(params[k]).dtype for k in self._names])

        rows = max(1, _cdiv(self._total, _EMA_LANES))
        block_rows = min(_EMA_BLOCK_ROWS, rows)
        self._rows_pad = _round_up(rows, block_rows)

        # copy.deepcopy(model) equivalent: own copy of the averaged parameters.
        self.avg_flat = self._flatten(params)

        # TODO(synk): distributed / deepspeed wrapping, update_buffers and the
        # buffer-sync loop are host/framework plumbing with no Pallas compute.

    def _flatten(self, params):
        flat = jnp.concatenate(
            [jnp.ravel(jnp.asarray(params[k])).astype(self._dtype) for k in self._names])
        pad = self._rows_pad * _EMA_LANES - self._total
        if pad:
            flat = jnp.pad(flat, (0, pad))
        return flat.reshape(self._rows_pad, _EMA_LANES)

    @property
    def avg_parameters(self):
        flat = self.avg_flat.reshape(-1)
        out = {}
        for k in self._names:
            o, s = self._offsets[k], self._sizes[k]
            out[k] = flat[o:o + s].reshape(self._shapes[k])
        return out

    def __call__(self, x):
        """Forward method of the averaged model (Pallas fused forward kernel)."""
        return forward_inner(self.avg_parameters, x)

    def update_parameters(self, src_params):
        if self.steps == 0:
            self.avg_flat = self._flatten(src_params)            # copy_ at step 0
        elif self.steps % self.interval == 0:
            momentum = max(self.momentum, self.gamma / (self.gamma + self.steps))
            mom = jnp.full((1, 1), momentum, dtype=jnp.float32)
            self.avg_flat = _ema_update_flat(mom, self.avg_flat, self._flatten(src_params))
        self.steps += 1


# ---------------------------------------------------------------------------
# Demo / self-check
# ---------------------------------------------------------------------------
def _init_params(key, c_in=4, c_hid=8, c_out=4, scale=0.1):
    k1, k2, k3, k4 = jax.random.split(key, 4)
    return {
        "w1": scale * jax.random.normal(k1, (c_hid, c_in), jnp.float32),   # OI of 1x1 conv
        "b1": scale * jax.random.normal(k2, (c_hid,), jnp.float32),
        "w2": scale * jax.random.normal(k3, (c_out, c_hid), jnp.float32),
        "b2": scale * jax.random.normal(k4, (c_out,), jnp.float32),
    }


def _forward_ref(params, x_nchw):
    n, c, hgt, wid = x_nchw.shape
    x = x_nchw.reshape(n, c, hgt * wid)
    h1 = jnp.einsum("oc,ncp->nop", params["w1"], x) + params["b1"][None, :, None]
    h1 = jnp.maximum(h1, 0.0)
    y = jnp.einsum("oc,ncp->nop", params["w2"], h1) + params["b2"][None, :, None]
    return y.reshape(n, -1, hgt, wid)


if __name__ == "__main__":
    key = jax.random.PRNGKey(0)
    k_init, k_src, k_x = jax.random.split(key, 3)

    init_params = _init_params(k_init)
    ema = MomentumAvgModelPallas(init_params, momentum=0.0002, gamma=100, interval=1)

    # step 0: copies source params into the averaged model
    ema.update_parameters(init_params)

    # step 1: EMA lerp against "trained" source params (fused Pallas EMA kernel)
    src_params = {
        k: v + 0.05 * jax.random.normal(jax.random.fold_in(k_src, i), v.shape, v.dtype)
        for i, (k, v) in enumerate(init_params.items())
    }
    ema.update_parameters(src_params)

    # reference EMA check
    mom = max(ema.momentum, ema.gamma / (ema.gamma + 1))
    avg_now = ema.avg_parameters
    for k in init_params:
        ref = init_params[k] + (src_params[k] - init_params[k]) * mom
        np.testing.assert_allclose(np.asarray(avg_now[k]), np.asarray(ref),
                                   rtol=1e-5, atol=1e-6)

    # forward pass of the averaged model (Pallas fused forward kernel), NCHW input
    x = jax.random.normal(k_x, (2, 4, 16, 16), jnp.float32)
    y = ema(x)
    y = jax.block_until_ready(y)

    y_ref = _forward_ref(ema.avg_parameters, x)
    np.testing.assert_allclose(np.asarray(y), np.asarray(y_ref), rtol=1e-4, atol=1e-5)
    assert y.shape == (2, 4, 16, 16)

    print("KERNEL_OK")
</pallas_src>

<mosaic_0001>
module attributes {stable_mosaic.version = 11 : i64} {
  func.func @_ema_lerp_kernel(%arg0: i32, %arg1: memref<1x1xf32, #tpu.memory_space<smem>>, %arg2: memref<1x1024xf32, #tpu.memory_space<vmem>>, %arg3: memref<1x1024xf32, #tpu.memory_space<vmem>>, %arg4: memref<1x1024xf32, #tpu.memory_space<vmem>>) attributes {dimension_semantics = [#tpu.dimension_semantics<parallel>], iteration_bounds = array<i64: 1>, scalar_prefetch = 0 : i64, scratch_operands = 0 : i64, tpu.core_type = #tpu.core_type<tc>, window_params = [{transform_indices = @transform_0, window_bounds = array<i64: 1, 1>}, {transform_indices = @transform_1, window_bounds = array<i64: 1, 1024>}, {transform_indices = @transform_2, window_bounds = array<i64: 1, 1024>}, {transform_indices = @transform_3, window_bounds = array<i64: 1, 1024>}]} {
    %c0 = arith.constant 0 : index
    %c0_0 = arith.constant 0 : index
    %0 = memref.load %arg1[%c0, %c0_0] : memref<1x1xf32, #tpu.memory_space<smem>>
    %c0_1 = arith.constant 0 : index
    %c0_2 = arith.constant 0 : index
    %1 = vector.load %arg2[%c0_1, %c0_2] : memref<1x1024xf32, #tpu.memory_space<vmem>>, vector<1x1024xf32>
    %c0_3 = arith.constant 0 : index
    %c0_4 = arith.constant 0 : index
    %2 = vector.load %arg3[%c0_3, %c0_4] : memref<1x1024xf32, #tpu.memory_space<vmem>>, vector<1x1024xf32>
    %3 = arith.subf %2, %1 : vector<1x1024xf32>
    %4 = vector.broadcast %0 : f32 to vector<1x1024xf32>
    %5 = arith.mulf %3, %4 : vector<1x1024xf32>
    %6 = arith.addf %1, %5 : vector<1x1024xf32>
    %c0_5 = arith.constant 0 : index
    %c0_6 = arith.constant 0 : index
    %7 = vector.load %arg4[%c0_5, %c0_6] : memref<1x1024xf32, #tpu.memory_space<vmem>>, vector<1x1024xf32>
    tpu.vector_store %arg4[%c0_5, %c0_6], %6 {strides = array<i32>} : memref<1x1024xf32, #tpu.memory_space<vmem>>, vector<1x1024xf32>,
    return
  }
  func.func @transform_0(%arg0: i32) -> (i32, i32) {
    %c0_i32 = arith.constant 0 : i32
    %c0_i32_0 = arith.constant 0 : i32
    %c0_i32_1 = arith.constant 0 : i32
    return %c0_i32, %c0_i32_0 : i32, i32
  }
  func.func @transform_1(%arg0: i32) -> (i32, i32) {
    %c0_i32 = arith.constant 0 : i32
    %c0_i32_0 = arith.constant 0 : i32
    return %arg0, %c0_i32 : i32, i32
  }
  func.func @transform_2(%arg0: i32) -> (i32, i32) {
    %c0_i32 = arith.constant 0 : i32
    %c0_i32_0 = arith.constant 0 : i32
    return %arg0, %c0_i32 : i32, i32
  }
  func.func @transform_3(%arg0: i32) -> (i32, i32) {
    %c0_i32 = arith.constant 0 : i32
    %c0_i32_0 = arith.constant 0 : i32
    return %arg0, %c0_i32 : i32, i32
  }
}

</mosaic_0001>

<bundles_post_ra>
// kernel: _ema_update_flat.1
= control target key start
LH: loop header
LB: loop body
LE: loop exit
PB: predicated region body
PF: predicated region fallthrough
CT: control target
= control target key end

     0   :  { %9 = vsyncpa [#allocation4], 0  ;;  %s153_s0 = inlined_call_operand.<no memory space> [shape: f32[1,1], index: 0, kind: input, shape index: {}]   ;;  %s154_s1 = inlined_call_operand.hbm [shape: f32[1,1024], index: 1, kind: input, shape index: {}, may-alias: {1,3}]   ;;  %s155_s2 = inlined_call_operand.vmem [shape: f32[1,1024], index: 2, kind: input, shape index: {}]   ;;  %s156_s3 = inlined_call_operand.hbm [shape: f32[1,1024], index: 3, kind: output, shape index: {}, may-alias: {1,3}]  }
   0x1   :  { %10 = vsyncpa [#allocation5], 0  ;;  %s101_s12 = smov [#allocation3]   ;;  %s53_s16 = scalar_lea.hbm %s154_s1, 128 }
   0x2   :  { %s19_s13 = sshll.u32 %s101_s12, 4  ;;  %p54_p0 = scmp.ne.s32.totalorder %s154_s1, %s53_s16  ;;  %s20_s13 = int_to_ptr.vmem [resolvable:$true] %s19_s13 }
   0x3   :  { %p57_p1 = scmp.lt.u32.totalorder %s53_s16, %s154_s1 }
   0x5   :  { %p59_p2 = pnand %p57_p1, %p54_p0 }
   0x7   :  { %62 = shalt.err (!%p59_p2)
}
   0x8   :  { %s63_s21 = scalar_lea.vmem %s20_s13, 128  ;;  %p68_p4 = scmp.lt.s32.totalorder %s20_s13, %s20_s13 }
   0x9   :  { %p64_p3 = scmp.ne.s32.totalorder %s20_s13, %s63_s21  ;;  %p69_p5 = scmp.lt.s32.totalorder %s63_s21, %s63_s21 }
   0xb   :  { %p70_p6 = por %p69_p5, %p68_p4 }
   0xd   :  { %p71_p7 = pnand %p70_p6, %p64_p3 }
   0xf   :  { %74 = shalt.err (!%p71_p7)
}
  0x10   :  { %22 = dma.hbm_to_vmem [thread:$0]  %s154_s1, 128, %s20_s13, [#allocation4]  }
  0x11   :  { %97 = dma.done.wait [#allocation4], 128  }
  0x12   :  { %98 = vsyncadd [#allocation4], 4294967168  ;;  %v29_v0 = vld [vmem:[#allocation3] sm:$0xff]  ;;  %v32_v2 = vstv %s153_s0  ;;  %s102_s28 = smov [#allocation6]  }
  0x13   :  { %v30_v1 = vld [vmem:[%s155_s2] sm:$0xff]  ;;  %s42_s29 = sshll.u32 %s102_s28, 4  ;;  %s43_s29 = int_to_ptr.vmem [resolvable:$true] %s42_s29 }
  0x14   :  { %v31_v3 = vsub.f32 %v30_v1, %v29_v0  ;;  %s75_s30 = scalar_lea.vmem %s43_s29, 128  ;;  %p80_p9 = scmp.lt.s32.totalorder %s43_s29, %s43_s29 }
  0x15   :  { %p76_p8 = scmp.ne.s32.totalorder %s43_s29, %s75_s30  ;;  %p81_p10 = scmp.lt.s32.totalorder %s75_s30, %s75_s30 }
  0x16   :  { %v33_v4 = vmul.f32 %v32_v2, %v31_v3 }
  0x17   :  { %p82_p11 = por %p81_p10, %p80_p9 }
  0x18   :  { %v34_v5 = vadd.f32 %v33_v4, %v29_v0 }
  0x19   :  { %p83_p12 = pnand %p82_p11, %p76_p8 }
  0x1a   :  { %35 = vst [vmem:[#allocation6] sm:$0xff] %v34_v5 }
  0x1b   :  { %86 = shalt.err (!%p83_p12)
}
  0x1c   :  { %s87_s4 = scalar_lea.hbm %s156_s3, 128 }
  0x1d   :  { %p88_p13 = scmp.ne.s32.totalorder %s156_s3, %s87_s4  ;;  %p91_p0 = scmp.lt.u32.totalorder %s87_s4, %s156_s3 }
  0x1f   :  { %p93_p1 = pnand %p91_p0, %p88_p13 }
  0x21   :  { %96 = shalt.err (!%p93_p1)
}
  0x22   :  { %45 = dma.vmem_to_hbm [thread:$0]  %s43_s29, 128, %s156_s3, [#allocation5]  }
  0x23   :  { %99 = dma.done.wait [#allocation5], 128  }
  0x24   :  { %100 = vsyncadd [#allocation5], 4294967168 }
  0x25   :  { %49 = vsyncpa [#allocation4], 1 }
  0x26   :  { %50 = vsyncpa [#allocation5], 1 }

</bundles_post_ra>
